<compile_context>
chip_gen: v5e
topology: v5e:2x2
jax: 0.10.0
libtpu: 0.0.40
codegen_flags: <defaults>
</compile_context>

<pallas_src>
import jax
import jax.numpy as jnp
import numpy as np
from jax.experimental import pallas as pl
from jax.experimental.pallas import tpu as pltpu


def _patch_embed3d_kernel(x_ref, w_ref, b_ref, o_ref):
    # x_ref: (1, D+2, H+2, L)  bf16  padded slab for this batch (L = W*C)
    # w_ref: (3, 3*L, W*E)     bf16  banded weight (kh and (kw, c) folded in K)
    # b_ref: (1, W*E)          f32   bias tiled along W
    # o_ref: (1, 1, TD*H, W*E) f32   lane-dense output block (depth-block db)
    H = x_ref.shape[2] - 2
    L = x_ref.shape[3]
    M, WE = o_ref.shape[2], o_ref.shape[3]
    TD = M // H

    db = pl.program_id(1)
    d0 = db * TD

    # One contiguous (TD+2, H+2, L) window covers every depth tap of the block.
    win = x_ref[0, pl.ds(d0, TD + 2), :, :]

    # Accumulator starts as the broadcast bias (saves a separate epilogue add).
    # NOTE: for very large M (~256) a VMEM scratch accumulator would be
    # preferable to avoid vreg spills; at the shapes used here it fits in regs.
    acc = jnp.broadcast_to(b_ref[...], (M, WE))
    for kd in range(3):                                    # unrolled: 3 dots
        rows = win[kd:kd + TD]                             # (TD, H+2, L)
        # Fold kh into the contraction: lane-concat the 3 row-shifted views.
        lhs = jnp.concatenate([rows[:, kh:kh + H, :] for kh in range(3)],
                              axis=-1)                     # (TD, H, 3*L)
        lhs = lhs.reshape(M, 3 * L)
        acc = acc + jnp.dot(lhs, w_ref[kd],
                            preferred_element_type=jnp.float32)
    o_ref[...] = acc.reshape(1, 1, M, WE).astype(o_ref.dtype)
    # norm_layer defaults to None -> nn.Identity, so no norm is applied here.


def _choose_depth_tile(d, h, target_m=256):
    """Largest TD dividing D with TD*H <= target_m, keeping >= 2 depth blocks."""
    divisors = [t for t in range(1, d + 1) if d % t == 0]
    fits = [t for t in divisors if t * h <= target_m] or [1]
    td = max(fits)
    if td == d and d > 1:
        smaller = [t for t in fits if t < d]
        if smaller:
            # >= 2 depth blocks per batch: pipeline depth + v7x megacore.
            td = max(smaller)
    return td


def patch_embed_3d(x_ncdhw, weight, bias, *, compute_dtype=jnp.bfloat16):
    """Forward pass of PatchEmbed3D (Conv3d k=3,s=1,p=1 + permute; norm=Identity).

    Args:
      x_ncdhw: (N, C, D, H, W) float32  -- PyTorch Conv3d input layout.
      weight:  (E, C, 3, 3, 3) float32  -- PyTorch Conv3d weight layout (OIDHW).
      bias:    (E,)            float32
    Returns:
      (N, D, H, W, E) float32 -- matches the module's x.permute(0, 2, 3, 4, 1).
    """
    N, C, D, H, W = x_ncdhw.shape
    E = weight.shape[0]
    L = W * C
    WE = W * E

    TD = _choose_depth_tile(D, H, target_m=256)
    num_db = D // TD
    M = TD * H

    # Glue: cast -> channels-last -> fuse (W, C) into lanes -> D/H halo pad.
    # The W halo needs no padding: the banded weight drops out-of-range taps.
    x = jnp.transpose(x_ncdhw.astype(compute_dtype), (0, 2, 3, 4, 1))
    x = x.reshape(N, D, H, L)
    x_pad = jnp.pad(x, ((0, 0), (1, 1), (1, 1), (0, 0)))   # (N, D+2, H+2, L)
    # TODO(synk): the D/H halo zero-pad (and the cast/transpose) could move
    # fully in-kernel with boundary masking to drop one HBM pass over x.

    # Banded weight with kh *and* (kw, c) folded into the contraction:
    #   Wb[kd, kh*L + wi*C + c, w*E + e] = weight[e, c, kd, kh, wi - w + 1]
    # whenever 0 <= wi - w + 1 <= 2; taps that fall off the W edge are simply
    # dropped, which is exactly Conv3d's zero padding along W.
    wt = jnp.transpose(weight, (2, 3, 4, 1, 0))             # (kd, kh, kw, C, E)
    sel = np.zeros((3, W, W), np.float32)
    for kw in range(3):
        for w in range(W):
            wi = w + kw - 1
            if 0 <= wi < W:
                sel[kw, wi, w] = 1.0
    w_band = jnp.einsum('kiw,dhkce->dhicwe', jnp.asarray(sel), wt)
    w_band = w_band.reshape(3, 3 * L, WE).astype(compute_dtype)
    # TODO(synk): band useful-MAC density is ~3/W -- for W >~ 16 tile W inside
    # the lane fusion (or switch to an im2col LHS with a dense (27*C, E) rhs).

    b_tiled = jnp.tile(bias.astype(jnp.float32), W).reshape(1, WE)

    # VMEM budget: resident weight/bias (x1 buffer) + double-buffered input
    # slab and output block, with headroom; capped below v7x's 64 MiB VMEM.
    in_block = (D + 2) * (H + 2) * L * 2
    out_block = M * WE * 4
    resident = int(w_band.size) * 2 + int(b_tiled.size) * 4
    vmem_limit = min(
        max(int(1.5 * (resident + 2 * in_block + 2 * out_block)) + (4 << 20),
            16 << 20),
        48 << 20)

    out = pl.pallas_call(
        _patch_embed3d_kernel,
        out_shape=jax.ShapeDtypeStruct((N, num_db, M, WE), jnp.float32),
        grid_spec=pltpu.PrefetchScalarGridSpec(
            num_scalar_prefetch=0,
            grid=(N, num_db),
            in_specs=[
                # Whole padded slab per batch; constant along the depth-block
                # axis -> DMA'd from HBM only once per batch.
                pl.BlockSpec((1, D + 2, H + 2, L), lambda n, db: (n, 0, 0, 0)),
                # Weight / bias: whole-array resident VMEM operands
                # (single-buffered, never re-fetched).
                pl.BlockSpec(memory_space=pltpu.MemorySpace.VMEM),
                pl.BlockSpec(memory_space=pltpu.MemorySpace.VMEM),
            ],
            out_specs=pl.BlockSpec((1, 1, M, WE), lambda n, db: (n, db, 0, 0)),
        ),
        compiler_params=pltpu.CompilerParams(
            dimension_semantics=("parallel", "parallel"),
            vmem_limit_bytes=vmem_limit),
    )(x_pad, w_band, b_tiled)

    # (N, num_db, TD*H, W*E) -> (N, D, H, W, E): row-major identical reshape.
    return out.reshape(N, D, H, W, E)


if __name__ == "__main__":
    # Small shapes consistent with the module (in_channels=4).
    N, C, D, H, W = 2, 4, 8, 8, 8
    E = 32  # embed_dim

    key = jax.random.PRNGKey(0)
    kx, kw_, kb = jax.random.split(key, 3)
    x = jax.random.normal(kx, (N, C, D, H, W), dtype=jnp.float32)
    fan_in = C * 3 * 3 * 3
    weight = jax.random.normal(kw_, (E, C, 3, 3, 3), dtype=jnp.float32) / np.sqrt(
        np.float32(fan_in))
    bias = 0.01 * jax.random.normal(kb, (E,), dtype=jnp.float32)

    out = jax.block_until_ready(patch_embed_3d(x, weight, bias))

    # Reference: XLA Conv3d on the same bf16-rounded inputs (f32 accumulation),
    # + bias, then permute(0, 2, 3, 4, 1); norm = Identity.
    xr = x.astype(jnp.bfloat16).astype(jnp.float32)
    wr = weight.astype(jnp.bfloat16).astype(jnp.float32)
    ref = jax.lax.conv_general_dilated(
        xr, wr, window_strides=(1, 1, 1),
        padding=((1, 1), (1, 1), (1, 1)),
        dimension_numbers=("NCDHW", "OIDHW", "NCDHW"))
    ref = ref + bias[None, :, None, None, None]
    ref = jnp.transpose(ref, (0, 2, 3, 4, 1))
    ref = jax.block_until_ready(ref)

    assert out.shape == (N, D, H, W, E), out.shape
    np.testing.assert_allclose(np.asarray(out), np.asarray(ref),
                               rtol=1e-3, atol=1e-3)
    print("KERNEL_OK")
</pallas_src>

<mosaic_0001>
module attributes {stable_mosaic.version = 11 : i64} {
  func.func @_patch_embed3d_kernel(%arg0: i32, %arg1: i32, %arg2: memref<1x10x10x32xbf16, #tpu.memory_space<vmem>>, %arg3: memref<3x96x256xbf16, #tpu.memory_space<vmem>>, %arg4: memref<1x256xf32, #tpu.memory_space<vmem>>, %arg5: memref<1x1x32x256xf32, #tpu.memory_space<vmem>>) attributes {dimension_semantics = [#tpu.dimension_semantics<parallel>, #tpu.dimension_semantics<parallel>], iteration_bounds = array<i64: 2, 2>, scalar_prefetch = 0 : i64, scratch_operands = 0 : i64, tpu.core_type = #tpu.core_type<tc>, window_params = [{transform_indices = @transform_0, window_bounds = array<i64: 1, 10, 10, 32>}, {pipeline_mode = #tpu.pipeline_mode<synchronous>, transform_indices = @transform_1, window_bounds = array<i64: 3, 96, 256>}, {pipeline_mode = #tpu.pipeline_mode<synchronous>, transform_indices = @transform_2, window_bounds = array<i64: 1, 256>}, {transform_indices = @transform_3, window_bounds = array<i64: 1, 1, 32, 256>}]} {
    %c4_i32 = arith.constant 4 : i32
    %0 = arith.muli %arg1, %c4_i32 : i32
    %c0 = arith.constant 0 : index
    %1 = arith.index_cast %0 : i32 to index
    %c0_0 = arith.constant 0 : index
    %c0_1 = arith.constant 0 : index
    %2 = vector.load %arg2[%c0, %1, %c0_0, %c0_1] : memref<1x10x10x32xbf16, #tpu.memory_space<vmem>>, vector<1x6x10x32xbf16>
    %3 = vector.shape_cast %2 : vector<1x6x10x32xbf16> to vector<6x10x32xbf16>
    %c0_2 = arith.constant 0 : index
    %c0_3 = arith.constant 0 : index
    %4 = vector.load %arg4[%c0_2, %c0_3] : memref<1x256xf32, #tpu.memory_space<vmem>>, vector<1x256xf32>
    %5 = vector.shape_cast %4 : vector<1x256xf32> to vector<1x256xf32>
    %6 = vector.broadcast %5 : vector<1x256xf32> to vector<32x256xf32>
    %7 = vector.extract_strided_slice %3 {offsets = [0, 0, 0], sizes = [4, 10, 32], strides = [1, 1, 1]} : vector<6x10x32xbf16> to vector<4x10x32xbf16>
    %8 = vector.extract_strided_slice %7 {offsets = [0, 0, 0], sizes = [4, 8, 32], strides = [1, 1, 1]} : vector<4x10x32xbf16> to vector<4x8x32xbf16>
    %9 = vector.extract_strided_slice %7 {offsets = [0, 1, 0], sizes = [4, 8, 32], strides = [1, 1, 1]} : vector<4x10x32xbf16> to vector<4x8x32xbf16>
    %10 = vector.extract_strided_slice %7 {offsets = [0, 2, 0], sizes = [4, 8, 32], strides = [1, 1, 1]} : vector<4x10x32xbf16> to vector<4x8x32xbf16>
    %11 = tpu.concatenate %8, %9, %10 in 2 : vector<4x8x32xbf16>, vector<4x8x32xbf16>, vector<4x8x32xbf16> -> vector<4x8x96xbf16>
    %12 = vector.shape_cast %11 : vector<4x8x96xbf16> to vector<32x96xbf16>
    %c0_4 = arith.constant 0 : index
    %c0_5 = arith.constant 0 : index
    %c0_6 = arith.constant 0 : index
    %13 = vector.load %arg3[%c0_4, %c0_5, %c0_6] : memref<3x96x256xbf16, #tpu.memory_space<vmem>>, vector<1x96x256xbf16>
    %14 = vector.shape_cast %13 : vector<1x96x256xbf16> to vector<96x256xbf16>
    %cst = arith.constant dense<0.000000e+00> : vector<32x256xf32>
    %15 = tpu.matmul %12, %14, %cst {dimension_numbers = #tpu.dot_dimension_numbers<[1], [0], [0], [1], [0, 0, 1, 1], [], []>} : vector<32x96xbf16>, vector<96x256xbf16>, vector<32x256xf32> -> vector<32x256xf32>
    %16 = arith.addf %6, %15 : vector<32x256xf32>
    %17 = vector.extract_strided_slice %3 {offsets = [1, 0, 0], sizes = [4, 10, 32], strides = [1, 1, 1]} : vector<6x10x32xbf16> to vector<4x10x32xbf16>
    %18 = vector.extract_strided_slice %17 {offsets = [0, 0, 0], sizes = [4, 8, 32], strides = [1, 1, 1]} : vector<4x10x32xbf16> to vector<4x8x32xbf16>
    %19 = vector.extract_strided_slice %17 {offsets = [0, 1, 0], sizes = [4, 8, 32], strides = [1, 1, 1]} : vector<4x10x32xbf16> to vector<4x8x32xbf16>
    %20 = vector.extract_strided_slice %17 {offsets = [0, 2, 0], sizes = [4, 8, 32], strides = [1, 1, 1]} : vector<4x10x32xbf16> to vector<4x8x32xbf16>
    %21 = tpu.concatenate %18, %19, %20 in 2 : vector<4x8x32xbf16>, vector<4x8x32xbf16>, vector<4x8x32xbf16> -> vector<4x8x96xbf16>
    %22 = vector.shape_cast %21 : vector<4x8x96xbf16> to vector<32x96xbf16>
    %c1 = arith.constant 1 : index
    %c0_7 = arith.constant 0 : index
    %c0_8 = arith.constant 0 : index
    %23 = vector.load %arg3[%c1, %c0_7, %c0_8] : memref<3x96x256xbf16, #tpu.memory_space<vmem>>, vector<1x96x256xbf16>
    %24 = vector.shape_cast %23 : vector<1x96x256xbf16> to vector<96x256xbf16>
    %cst_9 = arith.constant dense<0.000000e+00> : vector<32x256xf32>
    %25 = tpu.matmul %22, %24, %cst_9 {dimension_numbers = #tpu.dot_dimension_numbers<[1], [0], [0], [1], [0, 0, 1, 1], [], []>} : vector<32x96xbf16>, vector<96x256xbf16>, vector<32x256xf32> -> vector<32x256xf32>
    %26 = arith.addf %16, %25 : vector<32x256xf32>
    %27 = vector.extract_strided_slice %3 {offsets = [2, 0, 0], sizes = [4, 10, 32], strides = [1, 1, 1]} : vector<6x10x32xbf16> to vector<4x10x32xbf16>
    %28 = vector.extract_strided_slice %27 {offsets = [0, 0, 0], sizes = [4, 8, 32], strides = [1, 1, 1]} : vector<4x10x32xbf16> to vector<4x8x32xbf16>
    %29 = vector.extract_strided_slice %27 {offsets = [0, 1, 0], sizes = [4, 8, 32], strides = [1, 1, 1]} : vector<4x10x32xbf16> to vector<4x8x32xbf16>
    %30 = vector.extract_strided_slice %27 {offsets = [0, 2, 0], sizes = [4, 8, 32], strides = [1, 1, 1]} : vector<4x10x32xbf16> to vector<4x8x32xbf16>
    %31 = tpu.concatenate %28, %29, %30 in 2 : vector<4x8x32xbf16>, vector<4x8x32xbf16>, vector<4x8x32xbf16> -> vector<4x8x96xbf16>
    %32 = vector.shape_cast %31 : vector<4x8x96xbf16> to vector<32x96xbf16>
    %c2 = arith.constant 2 : index
    %c0_10 = arith.constant 0 : index
    %c0_11 = arith.constant 0 : index
    %33 = vector.load %arg3[%c2, %c0_10, %c0_11] : memref<3x96x256xbf16, #tpu.memory_space<vmem>>, vector<1x96x256xbf16>
    %34 = vector.shape_cast %33 : vector<1x96x256xbf16> to vector<96x256xbf16>
    %cst_12 = arith.constant dense<0.000000e+00> : vector<32x256xf32>
    %35 = tpu.matmul %32, %34, %cst_12 {dimension_numbers = #tpu.dot_dimension_numbers<[1], [0], [0], [1], [0, 0, 1, 1], [], []>} : vector<32x96xbf16>, vector<96x256xbf16>, vector<32x256xf32> -> vector<32x256xf32>
    %36 = arith.addf %26, %35 : vector<32x256xf32>
    %37 = vector.shape_cast %36 : vector<32x256xf32> to vector<1x1x32x256xf32>
    %c0_13 = arith.constant 0 : index
    %c0_14 = arith.constant 0 : index
    %c0_15 = arith.constant 0 : index
    %c0_16 = arith.constant 0 : index
    %38 = vector.load %arg5[%c0_13, %c0_14, %c0_15, %c0_16] : memref<1x1x32x256xf32, #tpu.memory_space<vmem>>, vector<1x1x32x256xf32>
    tpu.vector_store %arg5[%c0_13, %c0_14, %c0_15, %c0_16], %37 {strides = array<i32>} : memref<1x1x32x256xf32, #tpu.memory_space<vmem>>, vector<1x1x32x256xf32>,
    return
  }
  func.func @transform_0(%arg0: i32, %arg1: i32) -> (i32, i32, i32, i32) {
    %c0_i32 = arith.constant 0 : i32
    %c0_i32_0 = arith.constant 0 : i32
    %c0_i32_1 = arith.constant 0 : i32
    %c0_i32_2 = arith.constant 0 : i32
    return %arg0, %c0_i32, %c0_i32_0, %c0_i32_1 : i32, i32, i32, i32
  }
  func.func @transform_1(%arg0: i32, %arg1: i32) -> (i32, i32, i32) {
    %c0_i32 = arith.constant 0 : i32
    %c0_i32_0 = arith.constant 0 : i32
    %c0_i32_1 = arith.constant 0 : i32
    %c0_i32_2 = arith.constant 0 : i32
    return %c0_i32, %c0_i32_0, %c0_i32_1 : i32, i32, i32
  }
  func.func @transform_2(%arg0: i32, %arg1: i32) -> (i32, i32) {
    %c0_i32 = arith.constant 0 : i32
    %c0_i32_0 = arith.constant 0 : i32
    %c0_i32_1 = arith.constant 0 : i32
    return %c0_i32, %c0_i32_0 : i32, i32
  }
  func.func @transform_3(%arg0: i32, %arg1: i32) -> (i32, i32, i32, i32) {
    %c0_i32 = arith.constant 0 : i32
    %c0_i32_0 = arith.constant 0 : i32
    %c0_i32_1 = arith.constant 0 : i32
    return %arg0, %arg1, %c0_i32, %c0_i32_0 : i32, i32, i32, i32
  }
}

</mosaic_0001>

<bundles_post_ra>
// kernel: tpu_custom_call.1
= control target key start
LH: loop header
LB: loop body
LE: loop exit
PB: predicated region body
PF: predicated region fallthrough
CT: control target
= control target key end

     0   :  { %8 = vsyncpa [#allocation3], 0  ;;  %s1588_s0 = inlined_call_operand.vmem [shape: bf16[2,10,10,32], index: 0, kind: input, shape index: {}]   ;;  %s1589_s1 = inlined_call_operand.hbm [shape: bf16[3,96,256], index: 1, kind: input, shape index: {}]   ;;  %s1590_s2 = inlined_call_operand.vmem [shape: f32[1,256], index: 2, kind: input, shape index: {}]   ;;  %s1591_s3 = inlined_call_operand.hbm [shape: f32[2,2,32,256], index: 3, kind: output, shape index: {}]  }
   0x1   :  { %9 = vsyncpa [#allocation4], 0 }
   0x2   :  { %11 = vsyncpa [#allocation4 + $0x1], 0  ;;  %s1362_s12 = smov 0   ;;  %s1364_s13 = smov 0  }
   0x3   :  { %s1366_s14 = smov 0   ;;  %s1368_s15 = smov 0  }
   0x4   :  { %s1370_s16 = smov 0   ;;  %s1372_s17 = smov 0  }
   0x5   :  { %s1374_s18 = smov 0   ;;  %s1376_s19 = smov 0  }
   0x6 LB: > { %s862_s20 = sadd.s32 4294967295, %s1333_s19   ;;  %s863_s21 = sadd.s32 4294967294, %s1333_s19   ;;  %s1333_s19 = sphi %s1376_s19, %s17_s19   ;;  %s1329_s18 = sphi %s1374_s18, %s1602_s18   ;;  %s1325_s17 = sphi %s1372_s17, %s1601_s17   ;;  %s1321_s16 = sphi %s1370_s16, %s1600_s16   ;;  %s1317_s15 = sphi %s1368_s15, %s1599_s15   ;;  %s1313_s14 = sphi %s1366_s14, %s1598_s14   ;;  %s1309_s13 = sphi %s1364_s13, %s1597_s13   ;;  %s1305_s12 = sphi %s1362_s12, %s1596_s12  }
   0x7   : > { %s26_s22 = sadd.s32 1, %s1325_s17  ;;  %s29_s23 = sadd.s32 1, %s1329_s18 }
   0x8   : > { %p27_p0 = scmp.ge.s32.totalorder %s26_s22, 2  ;;  %s106_s24 = sadd.s32 1, %s1313_s14 }
   0x9   : > { %p116_p1 = scmp.ne.s32.totalorder %s1313_s14, %s1309_s13  ;;  %p117_p2 = scmp.eq.s32.totalorder %s862_s20, 3 }
   0xa   : > { %s1604_s22 = smov (%p27_p0, %s26_s22), 0  ;;  %s1606_s23 = smov (!%p27_p0, %s29_s23), %s1329_s18 }
   0xb   : > { %s102_s25 = ssub.s32 %s1325_s17, %s1604_s22  ;;  %p1414_p3 = por %p117_p2, %p116_p1 }
   0xc   : > { %p31_p4 = scmp.ge.s32.totalorder %s1606_s23, 2  ;;  %p122_p5 = scmp.ne.s32.totalorder %s1309_s13, %s1305_s12 }
   0xd   : > { %p123_p6 = scmp.eq.s32.totalorder %s863_s21, 3  ;;  %p864_p7 = scmp.ge.s32.totalorder %s1333_s19, 1 }
   0xe   : > { %s1608_s23 = smov (%p31_p4, %s1606_s23), 0  ;;  %p130_p9 = scmp.lt.s32.totalorder %s1333_s19, 5 }
   0xf   : > { %p1423_p8 = por %p123_p6, %p122_p5  ;;  %s101_s28 = ssub.s32 %s1329_s18, %s1608_s23 }
  0x10   : > { %s103_s29 = sor.u32 %s102_s25, %s101_s28  ;;  %p1430_p10 = pnand %p864_p7, %p130_p9 }
  0x11   : > { %p104_p11 = scmp.eq.s32.totalorder %s103_s29, 0  ;;  %p1434_p12 = scmp.eq.s32.totalorder %s862_s20, 0 }
  0x12   : > { %p1123_p13 = pneg %p1430_p10  ;;  %s141_s7 = sshll.u32 %s1589_s1, 4  ;;  %s142_s7 = int_to_ptr.hbm [resolvable:$true] %s141_s7 }
  0x13   : > { %s1444_s8 = scalar_select %p104_p11, %s1313_s14, %s106_s24  }
  0x14   : > { %s1335_s9 = smov [#allocation2]   ;;  %p1124_p0 = pnand %p1434_p12, %p1123_p13 }
  0x15   : > { %s143_s10 = sshll.u32 %s1335_s9, 4  ;;  %s1336_s11 = smov 128   ;;  %s144_s10 = int_to_ptr.vmem [resolvable:$true] %s143_s10 }
  0x16   : > { %s1337_s20 = smov 8   ;;  %170 = sbr.rel (%p1430_p10) target bundleno = 353 (0x161), region = 32 }
  0x17   : > { %1126 = dma.hbm_to_vmem [thread:$0]  (!%p1124_p0), %s142_s7, 4608, %s144_s10, [#allocation3], %s1336_s11, %s1336_s11, %s1337_s20  }
  0x1b   : > { %1296 = dma.done.wait (%p1434_p12), [#allocation3], 4608  }
  0x1c   : > { %1298 = vsyncadd (%p1434_p12), [#allocation3], 4294962688  ;;  %p195_p1 = scmp.lt.s32.totalorder %s1321_s16, 1  ;;  %s1061_s25 = sshll.u32 %s1317_s15, 5  ;;  %v932_v23 = vld [vmem:[#allocation2 + $0x50] sm:$0xf] }
  0x1d   : > { %s1338_s30 = smov 64   ;;  %v1079_v24 = vld [vmem:[#allocation2 + $0x54] sm:$0xf0]  ;;  %v1078_v25 = vld [vmem:[#allocation2 + $0x54] sm:$0xf]  ;;  %s1339_s4 = smov 32  }
  0x1e   : > { %s196_s21 = scalar_select %p195_p1, %s1321_s16, 1  ;;  %v934_v30 = vld [vmem:[#allocation2 + $0x58] sm:$0xf0]  ;;  %v924_v33 = vld [vmem:[#allocation2 + $0x40] sm:$0xf]  ;;  %v933_v37 = vor.u32 %v1079_v24, %v932_v23  ;;  %vm291_vm0 = vcmask 261120  }
  0x1f   : > { %v1077_v34 = vld [vmem:[#allocation2 + $0x44] sm:$0xf0]  ;;  %v937_v38 = vor.u32 %v1078_v25, %v934_v30  ;;  %v1076_v39 = vld [vmem:[#allocation2 + $0x44] sm:$0xf]  ;;  %v926_v40 = vld [vmem:[#allocation2 + $0x48] sm:$0xf0] }
  0x20   : > { %s1116_s24 = smul.u32 80, %s196_s21  ;;  %v916_v43 = vld [vmem:[#allocation2 + $0x30] sm:$0xf]  ;;  %v1075_v44 = vld [vmem:[#allocation2 + $0x34] sm:$0xf0]  ;;  %404 = vmatpush.bf16.msra.mxu0 %v933_v37  ;;  %v925_v46 = vor.u32 %v1077_v34, %v924_v33  ;;  %v929_v47 = vor.u32 %v1076_v39, %v926_v40  ;;  %vm304_vm1 = vcmask 523264  }
  0x21   : > { %423 = vmatpush.bf16.msra.mxu1 %v937_v38  ;;  %v1074_v48 = vld [vmem:[#allocation2 + $0x34] sm:$0xf]  ;;  %v918_v49 = vld [vmem:[#allocation2 + $0x38] sm:$0xf0]  ;;  %v988_v50 = vld [vmem:[#allocation2 + $0xb0] sm:$0xf]  ;;  %v917_v58 = vor.u32 %v1075_v44, %v916_v43 }
  0x22   : > { %s199_s5 = scalar_lea.vmem %s1588_s0, %s1116_s24  ;;  %v1091_v53 = vld [vmem:[#allocation2 + $0xb4] sm:$0xf0]  ;;  %v1090_v54 = vld [vmem:[#allocation2 + $0xb4] sm:$0xf]  ;;  %v990_v55 = vld [vmem:[#allocation2 + $0xb8] sm:$0xf0]  ;;  %v921_v59 = vor.u32 %v1074_v48, %v918_v49 }
  0x23   : > { %s1460_s6 = scalar_lea.vmem %s199_s5, %s1061_s25  ;;  %v989_v56 = vor.u32 %v1091_v53, %v988_v50  ;;  %v993_v57 = vor.u32 %v1090_v54, %v990_v55  ;;  %v902_v23 = vld [vmem:[#allocation2 + $0x18] sm:$0xf0]  ;;  %v1069_v33 = vld [vmem:[#allocation2 + $0x4] sm:$0xf0]  ;;  %v1068_v34 = vld [vmem:[#allocation2 + $0x4] sm:$0xf] }
  0x24   : > { %v880_v0 = vld [vmem:[%s1460_s6 + $0x8] sm:$0xf]  ;;  %v1063_v1 = vld [vmem:[%s1460_s6 + $0x8] sm:$0x10]  ;;  %v884_v2 = vld [vmem:[%s1460_s6 + $0x10] sm:$0xf]  ;;  %405 = vmatpush.bf16.msra.mxu0 %v925_v46 }
  0x25   : > { %v881_v3 = vor.u32 %v1063_v1, %v880_v0  ;;  %v1064_v4 = vld [vmem:[%s1460_s6 + $0x10] sm:$0x10]  ;;  %v944_v5 = vld [vmem:[%s1460_s6 + $0x20] sm:$0xf]  ;;  %v1066_v6 = vld [vmem:[%s1460_s6 + $0x20] sm:$0x10]  ;;  %424 = vmatpush.bf16.msra.mxu1 %v929_v47  ;;  %555 = vmatpush.bf16.msra.mxu2 %v989_v56 }
  0x26   : > { %v885_v7 = vor.u32 %v1064_v4, %v884_v2  ;;  %v1468_v8 = vor.u32 %v1066_v6, %v944_v5  ;;  %v876_v9 = vld [vmem:[%s1460_s6] sm:$0xf]  ;;  %v1062_v13 = vld [vmem:[%s1460_s6] sm:$0x10]  ;;  %v888_v14 = vld [vmem:[%s1460_s6 + $0x18] sm:$0xf]  ;;  %574 = vmatpush.bf16.msra.mxu3 %v993_v57 }
  0x27   : > { %v280_v10 = vrot.slane %v881_v3, 1  ;;  %v251_v11 = vshrl.u32 %v881_v3, 16  ;;  %v253_v12 = vshll.u32 %v881_v3, 16  ;;  %v1065_v15 = vld [vmem:[%s1460_s6 + $0x18] sm:$0x10]  ;;  %v877_v20 = vor.u32 %v1062_v13, %v876_v9  ;;  %s192_s10 = sand.u32 1, %s1309_s13  }
  0x28   : > { %v260_v17 = vshll.u32 %v885_v7, 16  ;;  %v281_v18 = vrot.slane %v885_v7, 1  ;;  %v456_v19 = vshll.u32 %v1468_v8, 16  ;;  %v1476_v22 = vor.u32 %v1065_v15, %v888_v14  ;;  %v1000_v28 = vld [vmem:[%s1460_s6 + $0x28] sm:$0xf]  ;;  %406 = vmatpush.bf16.msra.mxu0 %v917_v58  ;;  %s869_s11 = sshll.u32 %s192_s10, 6 }
  0x29   : > { %285 = vrot.lane.b32.xlu1 %v280_v10, %s1338_s30  ;;  %v255_v16 = vrot.slane %v253_v12, 1  ;;  %v244_v26 = vshrl.u32 %v877_v20, 16  ;;  %v246_v27 = vshll.u32 %v877_v20, 16  ;;  %v1067_v29 = vld [vmem:[%s1460_s6 + $0x28] sm:$0x10]  ;;  %v258_v31 = vshrl.u32 %v885_v7, 16  ;;  %425 = vmatpush.bf16.msra.mxu1 %v921_v59 }
  0x2a   : > { %v262_v32 = vrot.slane %v260_v17, 1  ;;  %v454_v35 = vshrl.u32 %v1468_v8, 16  ;;  %v458_v41 = vrot.slane %v456_v19, 1  ;;  %v267_v42 = vshll.u32 %v1476_v22, 16  ;;  %v908_v9 = vld [vmem:[#allocation2 + $0x20] sm:$0xf] }
  0x2b   : > { %v256_v21 = vor.u32 %v255_v16, %v251_v11  ;;  %v248_v36 = vrot.slane %v246_v27, 1  ;;  %v1001_v52 = vor.u32 %v1067_v29, %v1000_v28  ;;  %v265_v61 = vshrl.u32 %v1476_v22, 16  ;;  %v1073_v10 = vld [vmem:[#allocation2 + $0x24] sm:$0xf0]  ;;  %v1072_v11 = vld [vmem:[#allocation2 + $0x24] sm:$0xf] }
  0x2c   : > { %v263_v51 = vor.u32 %v262_v32, %v258_v31  ;;  %v459_v60 = vor.u32 %v458_v41, %v454_v35  ;;  %v269_v62 = vrot.slane %v267_v42, 1  ;;  %v279_v0 = vrot.slane %v877_v20, 1  ;;  %v910_v13 = vld [vmem:[#allocation2 + $0x28] sm:$0xf0]  ;;  %v980_v14 = vld [vmem:[#allocation2 + $0xa0] sm:$0xf] }
  0x2d   : > { %273 = vrot.lane.b32.xlu0 %v256_v21, %s1339_s4  ;;  %v249_v45 = vor.u32 %v248_v36, %v244_v26  ;;  %v607_v63 = vshll.u32 %v1001_v52, 16  ;;  %v605_v2 = vshrl.u32 %v1001_v52, 16  ;;  %v282_v5 = vrot.slane %v1476_v22, 1  ;;  %v1089_v15 = vld [vmem:[#allocation2 + $0xa4] sm:$0xf0]  ;;  %s1532_s20 = scalar_lea.vmem [#allocation5], %s869_s11 }
  0x2e   : > { %v270_v1 = vor.u32 %v269_v62, %v265_v61  ;;  %v462_v6 = vrot.slane %v1468_v8, 1  ;;  %v613_v7 = vrot.slane %v1001_v52, 1  ;;  %v909_v12 = vor.u32 %v1073_v10, %v908_v9  ;;  %v982_v19 = vld [vmem:[#allocation2 + $0xa8] sm:$0xf0]  ;;  %v900_v20 = vld [vmem:[#allocation2 + $0x10] sm:$0xf] }
  0x2f   : > { %271 = vrot.lane.b32.xlu2 %v249_v45, %s1339_s4  ;;  %v609_v3 = vrot.slane %v607_v63, 1  ;;  %v913_v16 = vor.u32 %v1072_v11, %v910_v13  ;;  %v981_v17 = vor.u32 %v1089_v15, %v980_v14  ;;  %v1071_v21 = vld [vmem:[#allocation2 + $0x14] sm:$0xf0]  ;;  %v1070_v22 = vld [vmem:[#allocation2 + $0x14] sm:$0xf]  ;;  %vm395_vm2 = vcmask 785408  }
  0x30   : > { %407 = vmatpush.bf16.msra.mxu0 %v909_v12  ;;  %v901_v24 = vor.u32 %v1071_v21, %v900_v20  ;;  %v905_v25 = vor.u32 %v1070_v22, %v902_v23  ;;  %v972_v26 = vld [vmem:[#allocation2 + $0x90] sm:$0xf]  ;;  %v1087_v27 = vld [vmem:[#allocation2 + $0x94] sm:$0xf0]  ;;  %v1086_v28 = vld [vmem:[#allocation2 + $0x94] sm:$0xf] }
  0x31   : > { %287 = vrot.lane.b32.xlu1 %v281_v18, %s1338_s30  ;;  %v610_v4 = vor.u32 %v609_v3, %v605_v2  ;;  %v1088_v18 = vld [vmem:[#allocation2 + $0xa4] sm:$0xf]  ;;  %426 = vmatpush.bf16.msra.mxu1 %v913_v16  ;;  %v973_v29 = vor.u32 %v1087_v27, %v972_v26  ;;  %v974_v30 = vld [vmem:[#allocation2 + $0x98] sm:$0xf0]  ;;  %v892_v32 = vld [vmem:[#allocation2] sm:$0xf] }
  0x32   : > { %v985_v8 = vor.u32 %v1088_v18, %v982_v19  ;;  %556 = vmatpush.bf16.msra.mxu2 %v981_v17  ;;  %v977_v31 = vor.u32 %v1086_v28, %v974_v30  ;;  %v893_v35 = vor.u32 %v1069_v33, %v892_v32  ;;  %v894_v36 = vld [vmem:[#allocation2 + $0x8] sm:$0xf0]  ;;  %v964_v37 = vld [vmem:[#allocation2 + $0x80] sm:$0xf]  ;;  %v1085_v38 = vld [vmem:[#allocation2 + $0x84] sm:$0xf0] }
  0x33   : > { %v897_v39 = vor.u32 %v1068_v34, %v894_v36  ;;  %v965_v40 = vor.u32 %v1085_v38, %v964_v37  ;;  %v1084_v41 = vld [vmem:[#allocation2 + $0x84] sm:$0xf]  ;;  %v966_v42 = vld [vmem:[#allocation2 + $0x88] sm:$0xf0]  ;;  %v956_v44 = vld [vmem:[#allocation2 + $0x70] sm:$0xf] }
  0x34   : > { %575 = vmatpush.bf16.msra.mxu3 %v985_v8  ;;  %408 = vmatpush.bf16.msra.mxu0 %v901_v24  ;;  %v969_v43 = vor.u32 %v1084_v41, %v966_v42  ;;  %v1083_v45 = vld [vmem:[#allocation2 + $0x74] sm:$0xf0]  ;;  %v1082_v47 = vld [vmem:[#allocation2 + $0x74] sm:$0xf]  ;;  %v958_v48 = vld [vmem:[#allocation2 + $0x78] sm:$0xf0] }
  0x35   : > { %275 = vrot.lane.b32.xlu0 %v263_v51, %s1339_s4  ;;  %427 = vmatpush.bf16.msra.mxu1 %v905_v25  ;;  %v957_v46 = vor.u32 %v1083_v45, %v956_v44  ;;  %v961_v49 = vor.u32 %v1082_v47, %v958_v48  ;;  %v948_v50 = vld [vmem:[#allocation2 + $0x60] sm:$0xf]  ;;  %v1081_v51 = vld [vmem:[#allocation2 + $0x64] sm:$0xf0]  ;;  %v1080_v52 = vld [vmem:[#allocation2 + $0x64] sm:$0xf] }
  0x36   : > { %557 = vmatpush.bf16.msra.mxu2 %v973_v29  ;;  %v949_v53 = vor.u32 %v1081_v51, %v948_v50  ;;  %v950_v54 = vld [vmem:[#allocation2 + $0x68] sm:$0xf0]  ;;  %v1044_v56 = vld [vmem:[#allocation2 + $0x110] sm:$0xf]  ;;  %v1103_v57 = vld [vmem:[#allocation2 + $0x114] sm:$0xf0] }
  0x37   : > { %283 = vrot.lane.b32.xlu2 %v279_v0, %s1338_s30  ;;  %v953_v55 = vor.u32 %v1080_v52, %v950_v54  ;;  %v1102_v58 = vld [vmem:[#allocation2 + $0x114] sm:$0xf]  ;;  %v1045_v59 = vor.u32 %v1103_v57, %v1044_v56  ;;  %v1036_v63 = vld [vmem:[#allocation2 + $0x100] sm:$0xf]  ;;  %v1101_v0 = vld [vmem:[#allocation2 + $0x104] sm:$0xf0] }
  0x38   : > { %576 = vmatpush.bf16.msra.mxu3 %v977_v31  ;;  %409 = vmatpush.bf16.msra.mxu0 %v893_v35  ;;  %v1037_v2 = vor.u32 %v1101_v0, %v1036_v63  ;;  %v1038_v3 = vld [vmem:[#allocation2 + $0x108] sm:$0xf0]  ;;  %v1030_v10 = vld [vmem:[#allocation2 + $0xf8] sm:$0xf0]  ;;  %v205_v12 = vld [vmem:[%s1460_s6] sm:$0xf] }
  0x39   : > { %460 = vrot.lane.b32.xlu1 %v459_v60, %s1339_s4  ;;  %428 = vmatpush.bf16.msra.mxu1 %v897_v39  ;;  %v1046_v60 = vld [vmem:[#allocation2 + $0x118] sm:$0xf0]  ;;  %v1020_v13 = vld [vmem:[#allocation2 + $0xe0] sm:$0xf]  ;;  %v1097_v14 = vld [vmem:[#allocation2 + $0xe4] sm:$0xf0] }
  0x3a   : > { %558 = vmatpush.bf16.msra.mxu2 %v965_v40  ;;  %v1049_v61 = vor.u32 %v1102_v58, %v1046_v60  ;;  %v1096_v15 = vld [vmem:[#allocation2 + $0xe4] sm:$0xf]  ;;  %v1021_v16 = vor.u32 %v1097_v14, %v1020_v13  ;;  %v1022_v17 = vld [vmem:[#allocation2 + $0xe8] sm:$0xf0]  ;;  %v1012_v21 = vld [vmem:[#allocation2 + $0xd0] sm:$0xf] }
  0x3b   : > { %v1025_v20 = vor.u32 %v1096_v15, %v1022_v17  ;;  %v1095_v22 = vld [vmem:[#allocation2 + $0xd4] sm:$0xf0]  ;;  %v1094_v23 = vld [vmem:[#allocation2 + $0xd4] sm:$0xf]  ;;  %v207_v24 = vld [vmem:[%s1460_s6 + $0x8] sm:$0xf] }
  0x3c   : > { %577 = vmatpush.bf16.msra.mxu3 %v969_v43  ;;  %702 = vmatpush.bf16.msrb.mxu0 %v1045_v59  ;;  %v1013_v26 = vor.u32 %v1095_v22, %v1012_v21  ;;  %v1014_v27 = vld [vmem:[#allocation2 + $0xd8] sm:$0xf0]  ;;  %v1004_v29 = vld [vmem:[#allocation2 + $0xc0] sm:$0xf]  ;;  %v1093_v30 = vld [vmem:[#allocation2 + $0xc4] sm:$0xf0] }
  0x3d   : > { %277 = vrot.lane.b32.xlu0 %v270_v1, %s1339_s4  ;;  %721 = vmatpush.bf16.msrb.mxu1 %v1049_v61  ;;  %v1100_v1 = vld [vmem:[#allocation2 + $0x104] sm:$0xf]  ;;  %v1017_v28 = vor.u32 %v1094_v23, %v1014_v27  ;;  %v1005_v33 = vor.u32 %v1093_v30, %v1004_v29  ;;  %v1006_v34 = vld [vmem:[#allocation2 + $0xc8] sm:$0xf0]  ;;  %v209_v41 = vld [vmem:[%s1460_s6 + $0x10] sm:$0xf] }
  0x3e   : > { %559 = vmatpush.bf16.msra.mxu2 %v957_v46  ;;  %v1092_v31 = vld [vmem:[#allocation2 + $0xc4] sm:$0xf]  ;;  %v211_v48 = vld [vmem:[%s1460_s6 + $0x18] sm:$0xf]  ;;  %v217_v14 = vld [vmem:[%s1590_s2] sm:$0x3] }
  0x3f   : > { %289 = vrot.lane.b32.xlu2 %v282_v5, %s1338_s30  ;;  %v1028_v5 = vld [vmem:[#allocation2 + $0xf0] sm:$0xf]  ;;  %v1009_v37 = vor.u32 %v1092_v31, %v1006_v34  ;;  %s1055_s21 = sshll.u32 %s1317_s15, 3  ;;  %s1056_s24 = sshll.u32 %s1321_s16, 4 }
  0x40   : > { %578 = vmatpush.bf16.msra.mxu3 %v961_v49  ;;  %703 = vmatpush.bf16.msrb.mxu0 %v1037_v2  ;;  %s766_s25 = sadd.s32 %s1056_s24, %s1055_s21  ;;  %s769_s5 = sshll.u32 %s1532_s20, 4  ;;  %s770_s5 = int_to_ptr.vmem [resolvable:$true] %s769_s5 }
  0x41   : > { %611 = vrot.lane.b32.xlu1 %v610_v4, %s1339_s4  ;;  %v1041_v4 = vor.u32 %v1100_v1, %v1038_v3  ;;  %s1057_s28 = sshll.u32 %s766_s25, 3  ;;  %s1255_s21 = scalar_lea.hbm %s1591_s3, 256 }
  0x42   : > { %560 = vmatpush.bf16.msra.mxu2 %v949_v53  ;;  %v213_v53 = vld [vmem:[%s1460_s6 + $0x20] sm:$0xf]  ;;  %s768_s29 = scalar_lea.hbm %s1591_s3, %s1057_s28 }
  0x43   : > { %722 = vmatpush.bf16.msrb.mxu1 %v1041_v4 }
  0x44   : > { %579 = vmatpush.bf16.msra.mxu3 %v953_v55 }
  0x45   : > { %463 = vrot.lane.b32.xlu0 %v462_v6, %s1338_s30  ;;  %v1099_v6 = vld [vmem:[#allocation2 + $0xf4] sm:$0xf0] }
  0x46   : > { %1104 = vmatpush.bf16.msrb.mxu2 %v1045_v59  ;;  %v1029_v9 = vor.u32 %v1099_v6, %v1028_v5 }
  0x47   : > { %614 = vrot.lane.b32.xlu2 %v613_v7, %s1338_s30  ;;  %v1098_v7 = vld [vmem:[#allocation2 + $0xf4] sm:$0xf]  ;;  %s755_s30 = scalar_lea.sflag [#allocation4], %s192_s10 }
  0x48   : > { %1110 = vmatpush.bf16.msrb.mxu3 %v1049_v61  ;;  %v1033_v11 = vor.u32 %v1098_v7, %v1030_v10  ;;  %704 = vmatpush.bf16.msrb.mxu0 %v1029_v9 }
  0x4a   : > { %1105 = vmatpush.bf16.msrb.mxu2 %v1037_v2  ;;  %723 = vmatpush.bf16.msrb.mxu1 %v1033_v11 }
  0x4c   : > { %1111 = vmatpush.bf16.msrb.mxu3 %v1041_v4  ;;  %705 = vmatpush.bf16.msrb.mxu0 %v1021_v16 }
  0x4e   : > { %1106 = vmatpush.bf16.msrb.mxu2 %v1029_v9  ;;  %724 = vmatpush.bf16.msrb.mxu1 %v1025_v20 }
  0x50   : > { %1112 = vmatpush.bf16.msrb.mxu3 %v1033_v11  ;;  %706 = vmatpush.bf16.msrb.mxu0 %v1013_v26 }
  0x52   : > { %1107 = vmatpush.bf16.msrb.mxu2 %v1021_v16  ;;  %725 = vmatpush.bf16.msrb.mxu1 %v1017_v28 }
  0x54   : > { %1113 = vmatpush.bf16.msrb.mxu3 %v1025_v20  ;;  %707 = vmatpush.bf16.msrb.mxu0 %v1005_v33  ;;  %v220_v20 = vperm.slane %v217_v14, 1 }
  0x56   : > { %1108 = vmatpush.bf16.msrb.mxu2 %v1013_v26  ;;  %726 = vmatpush.bf16.msrb.mxu1 %v1009_v37 }
  0x58   : > { %1114 = vmatpush.bf16.msrb.mxu3 %v1017_v28 }
  0x5a   : > { %1109 = vmatpush.bf16.msrb.mxu2 %v1005_v33 }
  0x5c   : > { %1115 = vmatpush.bf16.msrb.mxu3 %v1009_v37 }
  0x89   : > { %v272_v62 = vpop.permute.xlu2 %271 }
  0x8a   : > { %v294_v18 = vsel %vm291_vm0, %v205_v12, %v272_v62  ;;  %v215_v62 = vld [vmem:[%s1460_s6 + $0x28] sm:$0xf]  ;;  %s771_s6 = sshll.u32 %s768_s29, 4  ;;  %s772_s6 = int_to_ptr.hbm [resolvable:$true] %s771_s6 }
  0x8b   : > { %s1249_s4 = sshra.s32 %s772_s6, 4  ;;  %s1250_s4 = int_to_ptr.hbm [resolvable:$true] %s1249_s4 }
  0x8c   : > { %s1251_s7 = scalar_lea.hbm %s1250_s4, 64  ;;  %p1256_p6 = scmp.lt.s32.totalorder %s1250_s4, %s1591_s3 }
  0x8d   : > { %p1252_p2 = scmp.ne.s32.totalorder %s1250_s4, %s1251_s7  ;;  %p1257_p7 = scmp.lt.s32.totalorder %s1255_s21, %s1251_s7 }
  0x8f   : > { %p1253_p4 = pnand %p1252_p2, %p1414_p3  ;;  %p1258_p9 = por %p1257_p7, %p1256_p6 }
  0x91   : > { %v284_v19 = vpop.permute.xlu2 %283  ;;  %p1254_p5 = pneg %p1253_p4 }
  0x92   : > { %v306_v25 = vsel %vm304_vm1, %v294_v18, %v284_v19  ;;  %v219_v19 = vperm.slane %v217_v14, 0 }
  0x93   : > { %v329_v36 = vunpack.c.l.b16 %v306_v25  ;;  %p1259_p10 = pnand %p1258_p9, %p1254_p5 }
  0x99   : > { %v290_v49 = vpop.permute.xlu2 %289 }
  0x9b   : > { %v286_v8 = vpop.permute.xlu1 %285 }
  0x9f   : > { %v274_v32 = vpop.permute.xlu0 %273 }
  0xa0   : > { %v297_v35 = vsel %vm291_vm0, %v207_v24, %v274_v32 }
  0xa1   : > { %v308_v38 = vsel %vm304_vm1, %v297_v35, %v286_v8  ;;  %v615_v1 = vpop.permute.xlu2 %614 }
  0xa2   : > { %v330_v39 = vunpack.c.l.b16 %v308_v38 }
  0xa3   : > { %v288_v42 = vpop.permute.xlu1 %287 }
  0xa4   : > { %v333_v40 = vpack.c.b16 %v330_v39, %v329_v36 }
  0xa6   : > { %938 = vmatmul.msk.bf16.vlgmr.msra.gmra.mxu0 %vm395_vm2, %v333_v40  ;;  %940 = vmatmul.msk.bf16.vlgmr.msra.gmra.mxu1 %vm395_vm2, %v333_v40 }
  0xa7   : > { %v276_v43 = vpop.permute.xlu0 %275 }
  0xa8   : > { %v300_v44 = vsel %vm291_vm0, %v209_v41, %v276_v43 }
  0xa9   : > { %v310_v45 = vsel %vm304_vm1, %v300_v44, %v288_v42 }
  0xaa   : > { %v331_v46 = vunpack.c.l.b16 %v310_v45 }
  0xab   : > { %v461_v55 = vpop.permute.xlu1 %460 }
  0xac   : > { %v485_v47 = vpack.c.b16 %v331_v46, %v330_v39  ;;  %v467_v57 = vsel %vm291_vm0, %v213_v53, %v461_v55 }
  0xae   : > { %994 = vmatmul.msk.bf16.vlgmr.msra.gmra.mxu2 %vm395_vm2, %v485_v47  ;;  %996 = vmatmul.msk.bf16.vlgmr.msra.gmra.mxu3 %vm395_vm2, %v485_v47 }
  0xaf   : > { %v278_v50 = vpop.permute.xlu0 %277 }
  0xb0   : > { %v303_v51 = vsel %vm291_vm0, %v211_v48, %v278_v50 }
  0xb1   : > { %v312_v52 = vsel %vm304_vm1, %v303_v51, %v290_v49 }
  0xb2   : > { %v332_v54 = vunpack.c.l.b16 %v312_v52 }
  0xb3   : > { %v612_v63 = vpop.permute.xlu1 %611 }
  0xb4   : > { %v334_v56 = vpack.c.b16 %v332_v54, %v331_v46  ;;  %v618_v0 = vsel %vm291_vm0, %v215_v62, %v612_v63 }
  0xb5   : > { %v620_v2 = vsel %vm304_vm1, %v618_v0, %v615_v1 }
  0xb6   : > { %939 = vmatmul.msk.bf16.gmra.mxu0 %vm395_vm2, %v334_v56  ;;  %941 = vmatmul.msk.bf16.gmra.mxu1 %vm395_vm2, %v334_v56  ;;  %v635_v3 = vunpack.c.l.b16 %v620_v2 }
  0xb7   : > { %v464_v58 = vpop.permute.xlu0 %463 }
  0xb8   : > { %v469_v59 = vsel %vm304_vm1, %v467_v57, %v464_v58 }
  0xb9   : > { %v484_v60 = vunpack.c.l.b16 %v469_v59 }
  0xbb   : > { %v486_v61 = vpack.c.b16 %v484_v60, %v332_v54  ;;  %v636_v4 = vpack.c.b16 %v635_v3, %v484_v60 }
  0xbe   : > { %995 = vmatmul.msk.bf16.gmra.mxu2 %vm395_vm2, %v486_v61  ;;  %997 = vmatmul.msk.bf16.gmra.mxu3 %vm395_vm2, %v486_v61 }
  0xc6   : > { %1050 = vmatmul.msk.bf16.vlgmr.msrb.gmra.mxu0 %vm395_vm2, %v334_v56  ;;  %1052 = vmatmul.msk.bf16.vlgmr.msrb.gmra.mxu1 %vm395_vm2, %v334_v56 }
  0xce   : > { %1051 = vmatmul.msk.bf16.vlgmr.msrb.gmra.mxu2 %vm395_vm2, %v636_v4  ;;  %1053 = vmatmul.msk.bf16.vlgmr.msrb.gmra.mxu3 %vm395_vm2, %v636_v4 }
 0x123   : > { %v411_v5 = vpop.f32.mrf.mxu0  ;;  %v430_v6 = vpop.f32.mrf.mxu1 }
 0x124   : > { %v440_v8 = vadd.f32 %v411_v5, %v219_v19  ;;  %v441_v21 = vadd.f32 %v430_v6, %v220_v20 }
 0x12b   : > { %v413_v7 = vpop.f32.mrf.mxu0  ;;  %v432_v9 = vpop.f32.mrf.mxu1 }
 0x12c   : > { %v442_v30 = vadd.f32 %v413_v7, %v219_v19  ;;  %v443_v31 = vadd.f32 %v432_v9, %v220_v20 }
 0x131   : > { %v562_v10 = vpop.f32.mrf.mxu2  ;;  %v581_v11 = vpop.f32.mrf.mxu3 }
 0x132   : > { %v591_v24 = vadd.f32 %v562_v10, %v440_v8  ;;  %v592_v25 = vadd.f32 %v581_v11, %v441_v21 }
 0x133   : > { %v416_v12 = vpop.f32.mrf.mxu0  ;;  %v435_v13 = vpop.f32.mrf.mxu1 }
 0x134   : > { %v444_v40 = vadd.f32 %v416_v12, %v219_v19  ;;  %v445_v41 = vadd.f32 %v435_v13, %v220_v20 }
 0x139   : > { %v564_v15 = vpop.f32.mrf.mxu2  ;;  %v583_v16 = vpop.f32.mrf.mxu3 }
 0x13a   : > { %v593_v34 = vadd.f32 %v564_v15, %v442_v30  ;;  %v594_v35 = vadd.f32 %v583_v16, %v443_v31 }
 0x13b   : > { %v418_v17 = vpop.f32.mrf.mxu0  ;;  %v437_v18 = vpop.f32.mrf.mxu1 }
 0x13c   : > { %v446_v48 = vadd.f32 %v418_v17, %v219_v19  ;;  %v447_v49 = vadd.f32 %v437_v18, %v220_v20 }
 0x141   : > { %v567_v22 = vpop.f32.mrf.mxu2  ;;  %v586_v23 = vpop.f32.mrf.mxu3 }
 0x142   : > { %v595_v42 = vadd.f32 %v567_v22, %v444_v40  ;;  %v596_v43 = vadd.f32 %v586_v23, %v445_v41 }
 0x143   : > { %v709_v26 = vpop.f32.mrf.mxu0  ;;  %v728_v27 = vpop.f32.mrf.mxu1 }
 0x144   : > { %v738_v28 = vadd.f32 %v709_v26, %v591_v24  ;;  %v739_v29 = vadd.f32 %v728_v27, %v592_v25 }
 0x146   : > { %746 = vst [vmem:[%s1532_s20] sm:$0xff] %v738_v28 }
 0x147   : > { %747 = vst [vmem:[%s1532_s20 + $0x8] sm:$0xff] %v739_v29 }
 0x149   : > { %v569_v32 = vpop.f32.mrf.mxu2  ;;  %v588_v33 = vpop.f32.mrf.mxu3 }
 0x14a   : > { %v597_v50 = vadd.f32 %v569_v32, %v446_v48  ;;  %v598_v51 = vadd.f32 %v588_v33, %v447_v49 }
 0x14b   : > { %v711_v36 = vpop.f32.mrf.mxu0  ;;  %v730_v37 = vpop.f32.mrf.mxu1 }
 0x14c   : > { %v740_v38 = vadd.f32 %v711_v36, %v593_v34  ;;  %v741_v39 = vadd.f32 %v730_v37, %v594_v35 }
 0x14e   : > { %748 = vst [vmem:[%s1532_s20 + $0x10] sm:$0xff] %v740_v38 }
 0x14f   : > { %749 = vst [vmem:[%s1532_s20 + $0x18] sm:$0xff] %v741_v39 }
 0x151   : > { %v714_v44 = vpop.f32.mrf.mxu2  ;;  %v733_v45 = vpop.f32.mrf.mxu3 }
 0x152   : > { %v742_v46 = vadd.f32 %v714_v44, %v595_v42  ;;  %v743_v47 = vadd.f32 %v733_v45, %v596_v43 }
 0x154   : > { %750 = vst [vmem:[%s1532_s20 + $0x20] sm:$0xff] %v742_v46 }
 0x155   : > { %751 = vst [vmem:[%s1532_s20 + $0x28] sm:$0xff] %v743_v47 }
 0x159   : > { %v716_v52 = vpop.f32.mrf.mxu2  ;;  %v735_v53 = vpop.f32.mrf.mxu3 }
 0x15a   : > { %v744_v54 = vadd.f32 %v716_v52, %v597_v50  ;;  %v745_v55 = vadd.f32 %v735_v53, %v598_v51 }
 0x15c   : > { %752 = vst [vmem:[%s1532_s20 + $0x30] sm:$0xff] %v744_v54 }
 0x15d   : > { %753 = vst [vmem:[%s1532_s20 + $0x38] sm:$0xff] %v745_v55 }
 0x15e   : > { %1262 = shalt.err (!%p1259_p10)
}
 0x15f   : > { %s1340_s10 = smov 256   ;;  %s1341_s20 = smov 16  }
 0x160   : > { %1121 = dma.vmem_to_hbm [thread:$0]  (%p1414_p3), %s770_s5, 1024, %s772_s6, %s755_s30, %s1340_s10, %s1340_s10, %s1341_s20  }
 0x161 PF: > { %p1133_p11 = scmp.ge.s32.totalorder %s1333_s19, 2  ;;  %s786_s28 = sand.u32 1, %s1305_s12  }
 0x162   : > { %s787_s15 = scalar_lea.sflag [#allocation4], %s786_s28 }
 0x163   : > { %p1128_p12 = pnand %p1133_p11, %p1423_p8 }
 0x165   : > { %p1129_p13 = pneg %p1128_p12 }
 0x167   : > { %1300 = dma.done.wait (%p1129_p13), %s787_s15, 1024  }
 0x168   : > { %1302 = vsyncadd (%p1129_p13), %s787_s15, 4294966272  ;;  %s17_s19 = sadd.s32 1, %s1333_s19   ;;  %s1596_s12 = smov %s1309_s13 }
 0x169   : > { %p14_p0 = scmp.ge.s32.totalorder %s17_s19, 6   ;;  %s1597_s13 = smov %s1313_s14 }
 0x16a   : > { %s1598_s14 = smov %s1444_s8  ;;  %s1599_s15 = smov %s1325_s17 }
 0x16b   : > { %s1600_s16 = smov %s1329_s18  ;;  %s1601_s17 = smov %s1604_s22 }
 0x16c   : > { %s1602_s18 = smov %s1608_s23  ;;  %16 = sbr.rel (!%p14_p0) target bundleno = 6 (0x6), region = 75 }
 0x171   :  { %793 = vsyncpa [#allocation3], 1 }
 0x172   :  { %795 = vsyncpa [#allocation3 + $0x1], 1 }
 0x173   :  { %796 = vsyncpa [#allocation4], 1 }
 0x174   :  { %798 = vsyncpa [#allocation4 + $0x1], 1 }

</bundles_post_ra>
